<compile_context>
chip_gen: v7x
topology: tpu7x:2x2x1
jax: 0.10.0
libtpu: 0.0.40
codegen_flags: <defaults>
</compile_context>

<pallas_src>
import math
import jax
import jax.numpy as jnp
from jax.experimental import pallas as pl
from jax.experimental.pallas import tpu as pltpu


def _round_up(n, m):
    return ((n + m - 1) // m) * m


# ----------------------------------------------------------------------------
# Kernel: one grid step = one hidden tile of width tn (all four gates for it).
# Packed weight block columns are [i | f | o | g], each tn lanes wide.
# ----------------------------------------------------------------------------
def lstm_cell_kernel(xh_ref, c_ref, w_ref, b_ref, ht_ref, ct_ref):
    # (Bp, Kp) @ (Kp, 4*tn) -> (Bp, 4*tn), fp32 accumulation on the MXU.
    preact = jnp.dot(xh_ref[...], w_ref[...],
                     preferred_element_type=jnp.float32) + b_ref[...]
    tn = ht_ref.shape[-1]
    i_t = jax.nn.sigmoid(preact[:, 0 * tn:1 * tn])
    f_t = jax.nn.sigmoid(preact[:, 1 * tn:2 * tn])
    o_t = jax.nn.sigmoid(preact[:, 2 * tn:3 * tn])
    g_t = jnp.tanh(preact[:, 3 * tn:4 * tn])
    c_t = c_ref[...] * f_t + i_t * g_t            # fp32 cell state
    ct_ref[...] = c_t
    ht_ref[...] = (o_t * jnp.tanh(c_t)).astype(ht_ref.dtype)


# ----------------------------------------------------------------------------
# One-time parameter packing (hoisted out of the forward path).
# ----------------------------------------------------------------------------
def pack_lstm_params(params, tn=128, compute_dtype=jnp.bfloat16):
    w_i2h = params["w_i2h"]                      # (4H, In)
    w_h2h = params["w_h2h"]                      # (4H, H)
    bias = params["b_i2h"] + params["b_h2h"]     # (4H,)
    four_h, in_size = w_i2h.shape
    hidden = four_h // 4
    hp = _round_up(hidden, tn)
    n_tiles = hp // tn
    k = in_size + hidden
    kp = _round_up(k, 128)

    # Fused weight: rows = [x features ; h features], columns = preact dims.
    wt = jnp.concatenate([w_i2h, w_h2h], axis=1).T            # (K, 4H)
    wt = wt.reshape(k, 4, hidden)                              # gate-major cols
    wt = jnp.pad(wt, ((0, kp - k), (0, 0), (0, hp - hidden)))  # (Kp, 4, Hp)
    wt = wt.reshape(kp, 4, n_tiles, tn).transpose(0, 2, 1, 3)  # (Kp, T, 4, tn)
    w_packed = wt.reshape(kp, 4 * hp).astype(compute_dtype)

    b4 = bias.reshape(4, hidden)
    b4 = jnp.pad(b4, ((0, 0), (0, hp - hidden)))
    b_packed = (b4.reshape(4, n_tiles, tn).transpose(1, 0, 2)
                  .reshape(1, 4 * hp).astype(jnp.float32))

    return {
        "w": w_packed, "b": b_packed,
        "input_size": in_size, "hidden_size": hidden,
        "hp": hp, "kp": kp, "tn": tn, "n_tiles": n_tiles,
        "compute_dtype": compute_dtype,
    }


# ----------------------------------------------------------------------------
# Forward pass.
#   x:      (1, B, input_size)
#   hidden: (h, c), each (1, B, hidden_size)
# Returns (h_t, (h_t, c_t)) with shapes (1, B, hidden_size).
# ----------------------------------------------------------------------------
def lstm_cell_forward(x, hidden, packed):
    h, c = hidden
    B = x.shape[1]
    H = packed["hidden_size"]
    hp, kp, tn, n_tiles = packed["hp"], packed["kp"], packed["tn"], packed["n_tiles"]
    cdt = packed["compute_dtype"]

    bp = _round_up(max(B, 1), 8)
    x2 = x.reshape(B, -1)
    h2 = h.reshape(B, -1)
    c2 = c.reshape(B, -1)

    xh = jnp.concatenate([x2, h2], axis=1).astype(cdt)         # (B, K)
    k = xh.shape[1]
    xh = jnp.pad(xh, ((0, bp - B), (0, kp - k)))               # (Bp, Kp)
    c_pad = jnp.pad(c2.astype(jnp.float32),
                    ((0, bp - B), (0, hp - H)))                # (Bp, Hp) fp32

    out_dtype = x.dtype
    ht, ct = pl.pallas_call(
        lstm_cell_kernel,
        out_shape=(
            jax.ShapeDtypeStruct((bp, hp), out_dtype),
            jax.ShapeDtypeStruct((bp, hp), jnp.float32),
        ),
        grid=(n_tiles,),
        in_specs=[
            pl.BlockSpec((bp, kp), lambda j: (0, 0)),          # xh (resident)
            pl.BlockSpec((bp, tn), lambda j: (0, j)),          # c tile
            pl.BlockSpec((kp, 4 * tn), lambda j: (0, j)),      # packed W tile
            pl.BlockSpec((1, 4 * tn), lambda j: (0, j)),       # packed bias tile
        ],
        out_specs=(
            pl.BlockSpec((bp, tn), lambda j: (0, j)),
            pl.BlockSpec((bp, tn), lambda j: (0, j)),
        ),
        compiler_params=pltpu.CompilerParams(
            dimension_semantics=("parallel",),
            vmem_limit_bytes=32 * 1024 * 1024,
        ),
    )(xh, c_pad, packed["w"], packed["b"])

    h_t = ht[:B, :H].reshape(1, B, H)
    c_t = ct[:B, :H].astype(out_dtype).reshape(1, B, H)
    return h_t, (h_t, c_t)


# ----------------------------------------------------------------------------
# Init + pure-JAX reference of the PyTorch module's math.
# ----------------------------------------------------------------------------
def init_lstm_params(key, input_size, hidden_size, dtype=jnp.float32):
    std = 1.0 / math.sqrt(hidden_size)
    k1, k2, k3, k4 = jax.random.split(key, 4)
    u = lambda k, shape: jax.random.uniform(k, shape, dtype, minval=-std, maxval=std)
    return {
        "w_i2h": u(k1, (4 * hidden_size, input_size)),
        "b_i2h": u(k2, (4 * hidden_size,)),
        "w_h2h": u(k3, (4 * hidden_size, hidden_size)),
        "b_h2h": u(k4, (4 * hidden_size,)),
    }


def lstm_cell_reference(x, hidden, params):
    h, c = hidden
    B = x.shape[1]
    x2 = x.reshape(B, -1)
    h2 = h.reshape(B, -1)
    c2 = c.reshape(B, -1)
    H = h2.shape[-1]
    preact = (x2 @ params["w_i2h"].T + params["b_i2h"]
              + h2 @ params["w_h2h"].T + params["b_h2h"])
    gates = jax.nn.sigmoid(preact[:, :3 * H])
    g_t = jnp.tanh(preact[:, 3 * H:])
    i_t = gates[:, :H]
    f_t = gates[:, H:2 * H]
    o_t = gates[:, 2 * H:3 * H]
    c_t = c2 * f_t + i_t * g_t
    h_t = o_t * jnp.tanh(c_t)
    return h_t.reshape(1, B, H), c_t.reshape(1, B, H)


if __name__ == "__main__":
    input_size = 16
    hidden_size = 32
    batch = 8

    key = jax.random.PRNGKey(0)
    kp_, kx, kh, kc = jax.random.split(key, 4)

    params = init_lstm_params(kp_, input_size, hidden_size)
    x = jax.random.normal(kx, (1, batch, input_size), jnp.float32)
    h0 = jax.random.normal(kh, (1, batch, hidden_size), jnp.float32)
    c0 = jax.random.normal(kc, (1, batch, hidden_size), jnp.float32)

    h_ref, c_ref = lstm_cell_reference(x, (h0, c0), params)

    # 1) Exact-math check: pack with fp32 compute dtype (tight tolerance).
    packed_f32 = pack_lstm_params(params, tn=128, compute_dtype=jnp.float32)
    h_t, (_, c_t) = lstm_cell_forward(x, (h0, c0), packed_f32)
    jax.block_until_ready((h_t, c_t))
    assert h_t.shape == (1, batch, hidden_size)
    assert c_t.shape == (1, batch, hidden_size)
    assert jnp.allclose(h_t, h_ref, atol=1e-4, rtol=1e-4)
    assert jnp.allclose(c_t, c_ref, atol=1e-4, rtol=1e-4)

    # 2) Optimized path: bf16 weights/activations, fp32 accumulation & cell state.
    packed_bf16 = pack_lstm_params(params, tn=128, compute_dtype=jnp.bfloat16)
    h_b, (_, c_b) = lstm_cell_forward(x, (h0, c0), packed_bf16)
    jax.block_until_ready((h_b, c_b))
    assert jnp.allclose(h_b, h_ref, atol=3e-2, rtol=3e-2)
    assert jnp.allclose(c_b, c_ref, atol=3e-2, rtol=3e-2)

    print("KERNEL_OK")
</pallas_src>

<mosaic_0001>
module attributes {stable_mosaic.version = 11 : i64} {
  func.func @lstm_cell_kernel(%arg0: i32, %arg1: memref<8x128xf32, #tpu.memory_space<vmem>>, %arg2: memref<8x128xf32, #tpu.memory_space<vmem>>, %arg3: memref<128x512xf32, #tpu.memory_space<vmem>>, %arg4: memref<1x512xf32, #tpu.memory_space<vmem>>, %arg5: memref<8x128xf32, #tpu.memory_space<vmem>>, %arg6: memref<8x128xf32, #tpu.memory_space<vmem>>) attributes {dimension_semantics = [#tpu.dimension_semantics<parallel>], iteration_bounds = array<i64: 1>, scalar_prefetch = 0 : i64, scratch_operands = 0 : i64, tpu.core_type = #tpu.core_type<tc>, window_params = [{pipeline_mode = #tpu.pipeline_mode<synchronous>, transform_indices = @transform_0, window_bounds = array<i64: 8, 128>}, {transform_indices = @transform_1, window_bounds = array<i64: 8, 128>}, {transform_indices = @transform_2, window_bounds = array<i64: 128, 512>}, {transform_indices = @transform_3, window_bounds = array<i64: 1, 512>}, {transform_indices = @transform_4, window_bounds = array<i64: 8, 128>}, {transform_indices = @transform_5, window_bounds = array<i64: 8, 128>}]} {
    %c0 = arith.constant 0 : index
    %c0_0 = arith.constant 0 : index
    %0 = vector.load %arg1[%c0, %c0_0] : memref<8x128xf32, #tpu.memory_space<vmem>>, vector<8x128xf32>
    %c0_1 = arith.constant 0 : index
    %c0_2 = arith.constant 0 : index
    %1 = vector.load %arg3[%c0_1, %c0_2] : memref<128x512xf32, #tpu.memory_space<vmem>>, vector<128x512xf32>
    %cst = arith.constant dense<0.000000e+00> : vector<8x512xf32>
    %2 = tpu.matmul %0, %1, %cst {dimension_numbers = #tpu.dot_dimension_numbers<[1], [0], [0], [1], [0, 0, 1, 1], [], []>} : vector<8x128xf32>, vector<128x512xf32>, vector<8x512xf32> -> vector<8x512xf32>
    %c0_3 = arith.constant 0 : index
    %c0_4 = arith.constant 0 : index
    %3 = vector.load %arg4[%c0_3, %c0_4] : memref<1x512xf32, #tpu.memory_space<vmem>>, vector<1x512xf32>
    %4 = vector.broadcast %3 : vector<1x512xf32> to vector<8x512xf32>
    %5 = arith.addf %2, %4 : vector<8x512xf32>
    %6 = vector.extract_strided_slice %5 {offsets = [0, 0], sizes = [8, 128], strides = [1, 1]} : vector<8x512xf32> to vector<8x128xf32>
    %7 = arith.negf %6 : vector<8x128xf32>
    %8 = math.exp %7 : vector<8x128xf32>
    %cst_5 = arith.constant 1.000000e+00 : f32
    %9 = vector.broadcast %cst_5 : f32 to vector<8x128xf32>
    %10 = arith.addf %9, %8 : vector<8x128xf32>
    %11 = arith.divf %9, %10 : vector<8x128xf32>
    %12 = vector.extract_strided_slice %5 {offsets = [0, 128], sizes = [8, 128], strides = [1, 1]} : vector<8x512xf32> to vector<8x128xf32>
    %13 = arith.negf %12 : vector<8x128xf32>
    %14 = math.exp %13 : vector<8x128xf32>
    %cst_6 = arith.constant 1.000000e+00 : f32
    %15 = vector.broadcast %cst_6 : f32 to vector<8x128xf32>
    %16 = arith.addf %15, %14 : vector<8x128xf32>
    %17 = arith.divf %15, %16 : vector<8x128xf32>
    %18 = vector.extract_strided_slice %5 {offsets = [0, 256], sizes = [8, 128], strides = [1, 1]} : vector<8x512xf32> to vector<8x128xf32>
    %19 = arith.negf %18 : vector<8x128xf32>
    %20 = math.exp %19 : vector<8x128xf32>
    %cst_7 = arith.constant 1.000000e+00 : f32
    %21 = vector.broadcast %cst_7 : f32 to vector<8x128xf32>
    %22 = arith.addf %21, %20 : vector<8x128xf32>
    %23 = arith.divf %21, %22 : vector<8x128xf32>
    %24 = vector.extract_strided_slice %5 {offsets = [0, 384], sizes = [8, 128], strides = [1, 1]} : vector<8x512xf32> to vector<8x128xf32>
    %25 = math.tanh %24 : vector<8x128xf32>
    %c0_8 = arith.constant 0 : index
    %c0_9 = arith.constant 0 : index
    %26 = vector.load %arg2[%c0_8, %c0_9] : memref<8x128xf32, #tpu.memory_space<vmem>>, vector<8x128xf32>
    %27 = arith.mulf %26, %17 : vector<8x128xf32>
    %28 = arith.mulf %11, %25 : vector<8x128xf32>
    %29 = arith.addf %27, %28 : vector<8x128xf32>
    %c0_10 = arith.constant 0 : index
    %c0_11 = arith.constant 0 : index
    %30 = vector.load %arg6[%c0_10, %c0_11] : memref<8x128xf32, #tpu.memory_space<vmem>>, vector<8x128xf32>
    tpu.vector_store %arg6[%c0_10, %c0_11], %29 {strides = array<i32>} : memref<8x128xf32, #tpu.memory_space<vmem>>, vector<8x128xf32>,
    %31 = math.tanh %29 : vector<8x128xf32>
    %32 = arith.mulf %23, %31 : vector<8x128xf32>
    %c0_12 = arith.constant 0 : index
    %c0_13 = arith.constant 0 : index
    %33 = vector.load %arg5[%c0_12, %c0_13] : memref<8x128xf32, #tpu.memory_space<vmem>>, vector<8x128xf32>
    tpu.vector_store %arg5[%c0_12, %c0_13], %32 {strides = array<i32>} : memref<8x128xf32, #tpu.memory_space<vmem>>, vector<8x128xf32>,
    return
  }
  func.func @transform_0(%arg0: i32) -> (i32, i32) {
    %c0_i32 = arith.constant 0 : i32
    %c0_i32_0 = arith.constant 0 : i32
    %c0_i32_1 = arith.constant 0 : i32
    return %c0_i32, %c0_i32_0 : i32, i32
  }
  func.func @transform_1(%arg0: i32) -> (i32, i32) {
    %c0_i32 = arith.constant 0 : i32
    %c0_i32_0 = arith.constant 0 : i32
    return %c0_i32, %arg0 : i32, i32
  }
  func.func @transform_2(%arg0: i32) -> (i32, i32) {
    %c0_i32 = arith.constant 0 : i32
    %c0_i32_0 = arith.constant 0 : i32
    return %c0_i32, %arg0 : i32, i32
  }
  func.func @transform_3(%arg0: i32) -> (i32, i32) {
    %c0_i32 = arith.constant 0 : i32
    %c0_i32_0 = arith.constant 0 : i32
    return %c0_i32, %arg0 : i32, i32
  }
  func.func @transform_4(%arg0: i32) -> (i32, i32) {
    %c0_i32 = arith.constant 0 : i32
    %c0_i32_0 = arith.constant 0 : i32
    return %c0_i32, %arg0 : i32, i32
  }
  func.func @transform_5(%arg0: i32) -> (i32, i32) {
    %c0_i32 = arith.constant 0 : i32
    %c0_i32_0 = arith.constant 0 : i32
    return %c0_i32, %arg0 : i32, i32
  }
}

</mosaic_0001>

<bundles_post_ra>
// kernel: tpu_custom_call.1
= control target key start
LH: loop header
LB: loop body
LE: loop exit
PB: predicated region body
PF: predicated region fallthrough
CT: control target
= control target key end

     0   :  { %11 = vsyncpa [#allocation3], 0  ;;  %s654_s0 = inlined_call_operand.hbm [shape: f32[8,128], index: 0, kind: input, shape index: {}]   ;;  %s655_s1 = inlined_call_operand.hbm [shape: f32[8,128], index: 1, kind: input, shape index: {}]   ;;  %s656_s2 = inlined_call_operand.hbm [shape: f32[128,512], index: 2, kind: input, shape index: {}]   ;;  %s657_s3 = inlined_call_operand.vmem [shape: f32[1,512], index: 3, kind: input, shape index: {}]   ;;  %s658_s4 = inlined_call_operand.hbm [shape: f32[8,128], index: 4, kind: output, shape index: {0}]   ;;  %s659_s5 = inlined_call_operand.hbm [shape: f32[8,128], index: 5, kind: output, shape index: {1}]  }
   0x1   :  { %12 = vsyncpa [#allocation6], 0 }
   0x2   :  { %13 = vsyncpa [#allocation4], 0 }
   0x3   :  { %14 = vsyncpa [#allocation10], 0  ;;  %s553_s18 = smov [#allocation5]   ;;  %s554_s20 = smov [#allocation2]  }
   0x4   :  { %s31_s19 = sshll.u32 %s553_s18, 4  ;;  %s21_s21 = sshll.u32 %s554_s20, 4  ;;  %s32_s19 = int_to_ptr.vmem [resolvable:$true] %s31_s19  ;;  %s22_s21 = int_to_ptr.vmem [resolvable:$true] %s21_s21 }
   0x5   :  { %s435_s24 = scalar_lea.hbm %s655_s1, 128 }
   0x6   :  { %p436_p0 = scmp.ne.s32.totalorder %s655_s1, %s435_s24  ;;  %p439_p1 = scmp.lt.u32.totalorder %s435_s24, %s655_s1 }
   0x8   :  { %p441_p2 = pnand %p439_p1, %p436_p0 }
   0xa   :  { %444 = shalt.err (!%p441_p2)
}
   0xb   :  { %s445_s29 = scalar_lea.vmem %s32_s19, 128  ;;  %p450_p4 = scmp.lt.s32.totalorder %s32_s19, %s32_s19 }
   0xc   :  { %p446_p3 = scmp.ne.s32.totalorder %s32_s19, %s445_s29  ;;  %p451_p5 = scmp.lt.s32.totalorder %s445_s29, %s445_s29 }
   0xe   :  { %p452_p6 = por %p451_p5, %p450_p4 }
  0x10   :  { %p453_p7 = pnand %p452_p6, %p446_p3 }
  0x12   :  { %456 = shalt.err (!%p453_p7)
}
  0x13   :  { %34 = dma.hbm_to_vmem [thread:$0]  %s655_s1, 128, %s32_s19, [#allocation6]  }
  0x14   :  { %s457_s9 = scalar_lea.hbm %s654_s0, 128 }
  0x15   :  { %p458_p8 = scmp.ne.s32.totalorder %s654_s0, %s457_s9  ;;  %p461_p9 = scmp.lt.u32.totalorder %s457_s9, %s654_s0 }
  0x17   :  { %p463_p10 = pnand %p461_p9, %p458_p8 }
  0x19   :  { %466 = shalt.err (!%p463_p10)
}
  0x1a   :  { %s467_s14 = scalar_lea.vmem %s22_s21, 128  ;;  %p472_p12 = scmp.lt.s32.totalorder %s22_s21, %s22_s21 }
  0x1b   :  { %p468_p11 = scmp.ne.s32.totalorder %s22_s21, %s467_s14  ;;  %p473_p13 = scmp.lt.s32.totalorder %s467_s14, %s467_s14 }
  0x1d   :  { %p474_p0 = por %p473_p13, %p472_p12 }
  0x1f   :  { %p475_p1 = pnand %p474_p0, %p468_p11 }
  0x21   :  { %478 = shalt.err (!%p475_p1)
}
  0x22   :  { %24 = dma.hbm_to_vmem [thread:$0]  %s654_s0, 128, %s22_s21, [#allocation3]  }
  0x23   :  { %s555_s16 = smov [#allocation7]   ;;  %s479_s20 = scalar_lea.hbm %s656_s2, 8192 }
  0x24   :  { %s40_s17 = sshll.u32 %s555_s16, 4  ;;  %p480_p2 = scmp.ne.s32.totalorder %s656_s2, %s479_s20  ;;  %s41_s17 = int_to_ptr.vmem [resolvable:$true] %s40_s17 }
  0x25   :  { %p483_p3 = scmp.lt.u32.totalorder %s479_s20, %s656_s2 }
  0x27   :  { %p485_p4 = pnand %p483_p3, %p480_p2 }
  0x29   :  { %488 = shalt.err (!%p485_p4)
}
  0x2a   :  { %s489_s26 = scalar_lea.vmem %s41_s17, 8192  ;;  %p494_p6 = scmp.lt.s32.totalorder %s41_s17, %s41_s17 }
  0x2b   :  { %p490_p5 = scmp.ne.s32.totalorder %s41_s17, %s489_s26  ;;  %p495_p7 = scmp.lt.s32.totalorder %s489_s26, %s489_s26 }
  0x2d   :  { %p496_p8 = por %p495_p7, %p494_p6 }
  0x2f   :  { %p497_p9 = pnand %p496_p8, %p490_p5 }
  0x31   :  { %500 = shalt.err (!%p497_p9)
}
  0x32   :  { %s556_s0 = smov 512   ;;  %s557_s21 = smov 32  }
  0x33   :  { %46 = dma.hbm_to_vmem [thread:$0]  %s656_s2, 8192, %s41_s17, [#allocation6], %s556_s0, %s556_s0, %s557_s21  }
  0x34   :  { %545 = dma.done.wait [#allocation3], 128  }
  0x35   :  { %546 = vsyncadd [#allocation3], 4294967168 }
  0x36   :  { %547 = dma.done.wait [#allocation6], 8320  }
  0x37   :  { %548 = vsyncadd [#allocation6], 4294958976  ;;  %v558_v0 = vmov 0.0   ;;  %v60_v1 = vld [vmem:[#allocation7 + $0x8] sm:$0xff]  ;;  %v59_v3 = vld [vmem:[#allocation7] sm:$0xff] }
  0x38   :  { %209 = vmatprep.mubr.f32.mxu0 %v558_v0  ;;  %280 = vmatprep.mubr.f32.mxu1 %v558_v0  ;;  %v64_v2 = vld [vmem:[#allocation7 + $0x28] sm:$0xff]  ;;  %v63_v5 = vld [vmem:[#allocation7 + $0x20] sm:$0xff]  ;;  %v62_v19 = vld [vmem:[#allocation7 + $0x18] sm:$0xff] }
  0x39   :  { %v347_v4 = vpack.c.bf16 %v64_v2, %v60_v1  ;;  %v68_v6 = vld [vmem:[#allocation7 + $0x48] sm:$0xff]  ;;  %v349_v8 = vpack.c.bf16 %v63_v5, %v59_v3  ;;  %v67_v10 = vld [vmem:[#allocation7 + $0x40] sm:$0xff]  ;;  %v66_v20 = vld [vmem:[#allocation7 + $0x38] sm:$0xff] }
  0x3a   :  { %v72_v7 = vld [vmem:[#allocation7 + $0x68] sm:$0xff]  ;;  %v71_v11 = vld [vmem:[#allocation7 + $0x60] sm:$0xff]  ;;  %v379_v22 = vpack.c.bf16 %v66_v20, %v62_v19  ;;  %v61_v23 = vld [vmem:[#allocation7 + $0x10] sm:$0xff] }
  0x3b   :  { %v351_v9 = vpack.c.bf16 %v72_v7, %v68_v6  ;;  %v76_v12 = vld [vmem:[#allocation7 + $0x88] sm:$0xff]  ;;  %348 = vmatprep.subr.bf16.mxu0 %v347_v4  ;;  %v353_v14 = vpack.c.bf16 %v71_v11, %v67_v10  ;;  %v75_v15 = vld [vmem:[#allocation7 + $0x80] sm:$0xff]  ;;  %v65_v24 = vld [vmem:[#allocation7 + $0x30] sm:$0xff] }
  0x3c   :  { %v80_v13 = vld [vmem:[#allocation7 + $0xa8] sm:$0xff]  ;;  %350 = vmatpush1.bf16.msra.mxu0 %v349_v8  ;;  %v79_v16 = vld [vmem:[#allocation7 + $0xa0] sm:$0xff]  ;;  %v381_v25 = vpack.c.bf16 %v65_v24, %v61_v23  ;;  %380 = vmatprep.subr.bf16.mxu1 %v379_v22  ;;  %v70_v27 = vld [vmem:[#allocation7 + $0x58] sm:$0xff] }
  0x3d   :  { %352 = vmatprep.subr.bf16.mxu0 %v351_v9  ;;  %v355_v17 = vpack.c.bf16 %v80_v13, %v76_v12  ;;  %v84_v18 = vld [vmem:[#allocation7 + $0xc8] sm:$0xff]  ;;  %v357_v26 = vpack.c.bf16 %v79_v16, %v75_v15  ;;  %v74_v28 = vld [vmem:[#allocation7 + $0x78] sm:$0xff]  ;;  %v69_v29 = vld [vmem:[#allocation7 + $0x50] sm:$0xff] }
  0x3e   :  { %v88_v21 = vld [vmem:[#allocation7 + $0xe8] sm:$0xff]  ;;  %v83_v31 = vld [vmem:[#allocation7 + $0xc0] sm:$0xff]  ;;  %382 = vmatpush1.bf16.msra.mxu1 %v381_v25  ;;  %v383_v33 = vpack.c.bf16 %v74_v28, %v70_v27  ;;  %v73_v34 = vld [vmem:[#allocation7 + $0x70] sm:$0xff] }
  0x3f   :  { %v359_v30 = vpack.c.bf16 %v88_v21, %v84_v18  ;;  %v87_v32 = vld [vmem:[#allocation7 + $0xe0] sm:$0xff]  ;;  %v92_v35 = vld [vmem:[#allocation7 + $0x108] sm:$0xff]  ;;  %v385_v37 = vpack.c.bf16 %v73_v34, %v69_v29  ;;  %v78_v38 = vld [vmem:[#allocation7 + $0x98] sm:$0xff]  ;;  %v125_v34 = vlaneseq }
  0x40   :  { %354 = vmatpush1.bf16.msra.mxu0 %v353_v14  ;;  %v96_v36 = vld [vmem:[#allocation7 + $0x128] sm:$0xff]  ;;  %384 = vmatprep.subr.bf16.mxu1 %v383_v33  ;;  %v82_v39 = vld [vmem:[#allocation7 + $0xb8] sm:$0xff]  ;;  %v77_v40 = vld [vmem:[#allocation7 + $0x90] sm:$0xff]  ;;  %v361_v42 = vpack.c.bf16 %v87_v32, %v83_v31 }
  0x41   :  { %356 = vmatprep.subr.bf16.mxu0 %v355_v17  ;;  %v81_v41 = vld [vmem:[#allocation7 + $0xb0] sm:$0xff]  ;;  %v91_v43 = vld [vmem:[#allocation7 + $0x100] sm:$0xff]  ;;  %v387_v45 = vpack.c.bf16 %v82_v39, %v78_v38  ;;  %v363_v46 = vpack.c.bf16 %v96_v36, %v92_v35  ;;  %v100_v47 = vld [vmem:[#allocation7 + $0x148] sm:$0xff]  ;;  %v126_v35 = vshrl.u32 %v125_v34, 7 }
  0x42   :  { %v95_v44 = vld [vmem:[#allocation7 + $0x120] sm:$0xff]  ;;  %386 = vmatpush1.bf16.msra.mxu1 %v385_v37  ;;  %v389_v48 = vpack.c.bf16 %v81_v41, %v77_v40  ;;  %v86_v49 = vld [vmem:[#allocation7 + $0xd8] sm:$0xff]  ;;  %v104_v51 = vld [vmem:[#allocation7 + $0x168] sm:$0xff] }
  0x43   :  { %v90_v50 = vld [vmem:[#allocation7 + $0xf8] sm:$0xff]  ;;  %388 = vmatprep.subr.bf16.mxu1 %v387_v45  ;;  %v85_v53 = vld [vmem:[#allocation7 + $0xd0] sm:$0xff]  ;;  %v365_v55 = vpack.c.bf16 %v95_v44, %v91_v43  ;;  %v367_v58 = vpack.c.bf16 %v104_v51, %v100_v47  ;;  %v99_v59 = vld [vmem:[#allocation7 + $0x140] sm:$0xff]  ;;  %v127_v36 = vsub.s32 0, %v126_v35  ;;  %v131_v38 = vsub.s32 1, %v126_v35 }
  0x44   :  { %358 = vmatpush1.bf16.msra.mxu0 %v357_v26  ;;  %v391_v52 = vpack.c.bf16 %v90_v50, %v86_v49  ;;  %v89_v54 = vld [vmem:[#allocation7 + $0xf0] sm:$0xff]  ;;  %v94_v56 = vld [vmem:[#allocation7 + $0x118] sm:$0xff]  ;;  %v103_v60 = vld [vmem:[#allocation7 + $0x160] sm:$0xff]  ;;  %v135_v41 = vsub.s32 2, %v126_v35  ;;  %v139_v49 = vsub.s32 3, %v126_v35 }
  0x45   :  { %360 = vmatprep.subr.bf16.mxu0 %v359_v30  ;;  %v98_v57 = vld [vmem:[#allocation7 + $0x138] sm:$0xff]  ;;  %v108_v61 = vld [vmem:[#allocation7 + $0x188] sm:$0xff]  ;;  %v393_v62 = vpack.c.bf16 %v89_v54, %v85_v53  ;;  %v93_v1 = vld [vmem:[#allocation7 + $0x110] sm:$0xff]  ;;  %v369_v5 = vpack.c.bf16 %v103_v60, %v99_v59 }
  0x46   :  { %390 = vmatpush1.bf16.msra.mxu1 %v389_v48  ;;  %v112_v63 = vld [vmem:[#allocation7 + $0x1a8] sm:$0xff]  ;;  %v395_v0 = vpack.c.bf16 %v98_v57, %v94_v56  ;;  %v97_v2 = vld [vmem:[#allocation7 + $0x130] sm:$0xff]  ;;  %v102_v3 = vld [vmem:[#allocation7 + $0x158] sm:$0xff] }
  0x47   :  { %392 = vmatprep.subr.bf16.mxu1 %v391_v52  ;;  %v106_v4 = vld [vmem:[#allocation7 + $0x178] sm:$0xff]  ;;  %v371_v6 = vpack.c.bf16 %v112_v63, %v108_v61  ;;  %v107_v7 = vld [vmem:[#allocation7 + $0x180] sm:$0xff]  ;;  %v116_v9 = vld [vmem:[#allocation7 + $0x1c8] sm:$0xff]  ;;  %v397_v10 = vpack.c.bf16 %v97_v2, %v93_v1 }
  0x48   :  { %362 = vmatpush1.bf16.msra.mxu0 %v361_v42  ;;  %v111_v8 = vld [vmem:[#allocation7 + $0x1a0] sm:$0xff]  ;;  %v120_v11 = vld [vmem:[#allocation7 + $0x1e8] sm:$0xff]  ;;  %v399_v12 = vpack.c.bf16 %v106_v4, %v102_v3  ;;  %v101_v13 = vld [vmem:[#allocation7 + $0x150] sm:$0xff] }
  0x49   :  { %364 = vmatprep.subr.bf16.mxu0 %v363_v46  ;;  %v105_v14 = vld [vmem:[#allocation7 + $0x170] sm:$0xff]  ;;  %v110_v15 = vld [vmem:[#allocation7 + $0x198] sm:$0xff]  ;;  %v373_v17 = vpack.c.bf16 %v111_v8, %v107_v7  ;;  %v375_v18 = vpack.c.bf16 %v120_v11, %v116_v9  ;;  %v115_v19 = vld [vmem:[#allocation7 + $0x1c0] sm:$0xff] }
  0x4a   :  { %394 = vmatpush1.bf16.msra.mxu1 %v393_v62  ;;  %v114_v16 = vld [vmem:[#allocation7 + $0x1b8] sm:$0xff]  ;;  %v119_v20 = vld [vmem:[#allocation7 + $0x1e0] sm:$0xff]  ;;  %v401_v21 = vpack.c.bf16 %v105_v14, %v101_v13  ;;  %v109_v23 = vld [vmem:[#allocation7 + $0x190] sm:$0xff] }
  0x4b   :  { %396 = vmatprep.subr.bf16.mxu1 %v395_v0  ;;  %v403_v22 = vpack.c.bf16 %v114_v16, %v110_v15  ;;  %v113_v24 = vld [vmem:[#allocation7 + $0x1b0] sm:$0xff]  ;;  %v118_v25 = vld [vmem:[#allocation7 + $0x1d8] sm:$0xff]  ;;  %v377_v27 = vpack.c.bf16 %v119_v20, %v115_v19 }
  0x4c   :  { %366 = vmatpush1.bf16.msra.mxu0 %v365_v55  ;;  %v122_v26 = vld [vmem:[#allocation7 + $0x1f8] sm:$0xff]  ;;  %v405_v28 = vpack.c.bf16 %v113_v24, %v109_v23  ;;  %v117_v30 = vld [vmem:[#allocation7 + $0x1d0] sm:$0xff] }
  0x4d   :  { %368 = vmatprep.subr.bf16.mxu0 %v367_v58  ;;  %v407_v29 = vpack.c.bf16 %v122_v26, %v118_v25  ;;  %v121_v31 = vld [vmem:[#allocation7 + $0x1f0] sm:$0xff]  ;;  %v306_v62 = vld [vmem:[#allocation5] sm:$0xff] }
  0x4e   :  { %398 = vmatpush1.bf16.msra.mxu1 %v397_v10  ;;  %v58_v32 = vld [vmem:[#allocation2] sm:$0xff]  ;;  %v409_v33 = vpack.c.bf16 %v121_v31, %v117_v30 }
  0x4f   :  { %400 = vmatprep.subr.bf16.mxu1 %v399_v12  ;;  %v123_v37 = vld [vmem:[%s657_s3] sm:$0xf]  ;;  %s559_s3 = smov [#allocation9]  }
  0x50   :  { %370 = vmatpush1.bf16.msra.mxu0 %v369_v5  ;;  %v128_v39 = vrot.slane %v123_v37, %v127_v36  ;;  %v132_v40 = vrot.slane %v123_v37, %v131_v38  ;;  %v136_v47 = vrot.slane %v123_v37, %v135_v41  ;;  %v140_v53 = vrot.slane %v123_v37, %v139_v49  ;;  %s330_s30 = sshll.u32 %s559_s3, 4  ;;  %s331_s30 = int_to_ptr.vmem [resolvable:$true] %s330_s30 }
  0x51   :  { %372 = vmatprep.subr.bf16.mxu0 %v371_v6  ;;  %s501_s6 = scalar_lea.vmem %s331_s30, 128  ;;  %p506_p11 = scmp.lt.s32.totalorder %s331_s30, %s331_s30 }
  0x52   :  { %402 = vmatpush1.bf16.msra.mxu1 %v401_v21  ;;  %p502_p10 = scmp.ne.s32.totalorder %s331_s30, %s501_s6  ;;  %p507_p12 = scmp.lt.s32.totalorder %s501_s6, %s501_s6 }
  0x53   :  { %404 = vmatprep.subr.bf16.mxu1 %v403_v22 }
  0x54   :  { %374 = vmatpush1.bf16.msra.mxu0 %v373_v17  ;;  %p508_p13 = por %p507_p12, %p506_p11 }
  0x55   :  { %376 = vmatprep.subr.bf16.mxu0 %v375_v18 }
  0x56   :  { %406 = vmatpush1.bf16.msra.mxu1 %v405_v28  ;;  %p509_p0 = pnand %p508_p13, %p502_p10 }
  0x57   :  { %408 = vmatprep.subr.bf16.mxu1 %v407_v29 }
  0x58   :  { %378 = vmatpush1.bf16.msra.mxu0 %v377_v27 }
  0x5a   :  { %410 = vmatpush1.bf16.msra.mxu1 %v409_v33 }
  0x5b   :  { %210 = vmatmul.mubr.f32.vlgmr.msra.gmra.mrb[0].mxu0 %v58_v32 }
  0x5d   :  { %281 = vmatmul.mubr.f32.vlgmr.msra.gmra.mrb[0].mxu1 %v58_v32 }
 0x12e   :  { %v211_v42 = vpop.f32.mrb[0].mxu0 }
 0x12f   :  { %v212_v43 = vadd.f32 %v211_v42, %v128_v39  ;;  %v213_v44 = vpop.f32.mrb[1].mxu0 }
 0x130   :  { %v214_v45 = vadd.f32 %v213_v44, %v132_v40  ;;  %v282_v50 = vpop.f32.mrb[0].mxu1 }
 0x131   :  { %v344_v46 = vmul.f32 -1.442695, %v212_v43  ;;  %v284_v51 = vpop.f32.mrb[1].mxu1  ;;  %v283_v52 = vadd.f32 %v282_v50, %v136_v47 }
 0x132   :  { %v345_v48 = vmul.f32 -1.442695, %v214_v45  ;;  %v285_v55 = vadd.f32 %v284_v51, %v140_v53 }
 0x133   :  { %419 = vpow2.f32 %v344_v46  ;;  %v346_v54 = vmul.f32 -1.442695, %v283_v52 }
 0x134   :  { %421 = vpow2.f32 %v345_v48 }
 0x135   :  { %423 = vpow2.f32 %v346_v54 }
 0x136   :  { %425 = vtanh.f32 %v285_v55 }
 0x13d   :  { %v420_v56 = vpop.eup %419 }
 0x13e   :  { %v422_v57 = vpop.eup %421  ;;  %v290_v58 = vadd.f32 1.0, %v420_v56 }
 0x13f   :  { %v296_v59 = vadd.f32 1.0, %v422_v57  ;;  %v424_v60 = vpop.eup %423 }
 0x140   :  { %427 = vrcp.f32 %v290_v58  ;;  %v426_v61 = vpop.eup %425  ;;  %v302_v0 = vadd.f32 1.0, %v424_v60 }
 0x141   :  { %429 = vrcp.f32 %v296_v59 }
 0x142   :  { %431 = vrcp.f32 %v302_v0 }
 0x14a   :  { %v428_v63 = vpop.eup %427 }
 0x14b   :  { %v430_v1 = vpop.eup %429  ;;  %v308_v2 = vmul.f32 %v428_v63, %v426_v61 }
 0x14c   :  { %v307_v3 = vmul.f32 %v430_v1, %v306_v62 }
 0x14e   :  { %v309_v4 = vadd.f32 %v308_v2, %v307_v3 }
 0x150   :  { %310 = vst [vmem:[#allocation9] sm:$0xff] %v309_v4  ;;  %433 = vtanh.f32 %v309_v4 }
 0x151   :  { %512 = shalt.err (!%p509_p0)
}
 0x152   :  { %s513_s9 = scalar_lea.hbm %s659_s5, 128 }
 0x153   :  { %p514_p1 = scmp.ne.s32.totalorder %s659_s5, %s513_s9  ;;  %p517_p2 = scmp.lt.u32.totalorder %s513_s9, %s659_s5 }
 0x155   :  { %p519_p3 = pnand %p517_p2, %p514_p1 }
 0x157   :  { %522 = shalt.err (!%p519_p3)
}
 0x158   :  { %333 = dma.vmem_to_hbm [thread:$0]  %s331_s30, 128, %s659_s5, [#allocation10]   ;;  %v432_v5 = vpop.eup %431 }
 0x159   :  { %s560_s15 = smov [#allocation8]  }
 0x15a   :  { %s320_s16 = sshll.u32 %s560_s15, 4  ;;  %v434_v6 = vpop.eup %433  ;;  %s321_s16 = int_to_ptr.vmem [resolvable:$true] %s320_s16 }
 0x15b   :  { %v312_v7 = vmul.f32 %v434_v6, %v432_v5  ;;  %s523_s17 = scalar_lea.vmem %s321_s16, 128  ;;  %p528_p5 = scmp.lt.s32.totalorder %s321_s16, %s321_s16 }
 0x15c   :  { %p524_p4 = scmp.ne.s32.totalorder %s321_s16, %s523_s17  ;;  %p529_p6 = scmp.lt.s32.totalorder %s523_s17, %s523_s17 }
 0x15d   :  { %313 = vst [vmem:[#allocation8] sm:$0xff] %v312_v7 }
 0x15e   :  { %p530_p7 = por %p529_p6, %p528_p5 }
 0x160   :  { %p531_p8 = pnand %p530_p7, %p524_p4 }
 0x162   :  { %534 = shalt.err (!%p531_p8)
}
 0x163   :  { %s535_s20 = scalar_lea.hbm %s658_s4, 128 }
 0x164   :  { %p536_p9 = scmp.ne.s32.totalorder %s658_s4, %s535_s20  ;;  %p539_p10 = scmp.lt.u32.totalorder %s535_s20, %s658_s4 }
 0x166   :  { %p541_p11 = pnand %p539_p10, %p536_p9 }
 0x168   :  { %544 = shalt.err (!%p541_p11)
}
 0x169   :  { %323 = dma.vmem_to_hbm [thread:$0]  %s321_s16, 128, %s658_s4, [#allocation4]  }
 0x16a   :  { %549 = dma.done.wait [#allocation4], 128  }
 0x16b   :  { %550 = vsyncadd [#allocation4], 4294967168 }
 0x16c   :  { %551 = dma.done.wait [#allocation10], 128  }
 0x16d   :  { %552 = vsyncadd [#allocation10], 4294967168 }
 0x16e   :  { %340 = vsyncpa [#allocation3], 1 }
 0x16f   :  { %341 = vsyncpa [#allocation6], 1 }
 0x170   :  { %342 = vsyncpa [#allocation4], 1 }
 0x171   :  { %343 = vsyncpa [#allocation10], 1 }

</bundles_post_ra>
